<compile_context>
chip_gen: v7x
topology: tpu7x:2x2x1
jax: 0.10.0
libtpu: 0.0.40
codegen_flags: <defaults>
</compile_context>

<pallas_src>
import math

import jax
import jax.numpy as jnp
from jax.experimental import pallas as pl
from jax.experimental.pallas import tpu as pltpu

_LANE = 128
_MAX_ROW_TILE = 1024
_LN2 = math.log(2.0)


def adversarial_loss(y_pred, y_true):
    """BCE-with-logits, mean reduction, computed in a Pallas TPU kernel."""
    assert y_pred.shape == y_true.shape
    x = y_pred.reshape(-1)  # keep original dtype (e.g. bf16) through the DMA
    y = y_true.reshape(-1)
    n = x.size

    # Minimal padding to a lane multiple (zero for shapes divisible by 128).
    # Padded elements are x=0, y=0 -> loss ln(2) each, subtracted below.
    n_lane = pl.cdiv(n, _LANE) * _LANE
    lane_pad = n_lane - n
    if lane_pad:
        x = jnp.pad(x, (0, lane_pad))
        y = jnp.pad(y, (0, lane_pad))

    rows = n_lane // _LANE
    x2 = x.reshape(rows, _LANE)
    y2 = y.reshape(rows, _LANE)

    # Row tile: as large as possible (never shrinks toward 8).
    if rows <= _MAX_ROW_TILE:
        tm = rows  # block == full array extent -> always a legal block shape
    else:
        tm = _MAX_ROW_TILE
    grid_steps = pl.cdiv(rows, tm)
    ragged = (rows % tm) != 0  # only the last block needs masking

    def kernel(x_ref, y_ref, out_ref):
        i = pl.program_id(0)

        @pl.when(i == 0)
        def _():
            out_ref[...] = jnp.zeros_like(out_ref)

        xb = x_ref[...].astype(jnp.float32)
        yb = y_ref[...].astype(jnp.float32)

        # Stable BCE-with-logits.
        loss = jnp.maximum(xb, 0.0) - xb * yb + jnp.log1p(jnp.exp(-jnp.abs(xb)))

        if ragged:
            # Rows past the array extent in the last block hold unspecified
            # data; zero their contribution.
            valid = rows - i * tm
            row_id = jax.lax.broadcasted_iota(jnp.int32, (tm, _LANE), 0)
            loss = jnp.where(row_id < valid, loss, 0.0)

        # Cheap per-step sublane reduce into the lane-dense resident output.
        out_ref[...] += jnp.sum(loss, axis=0, keepdims=True)

    partial = pl.pallas_call(
        kernel,
        out_shape=jax.ShapeDtypeStruct((1, _LANE), jnp.float32),
        grid_spec=pltpu.PrefetchScalarGridSpec(
            num_scalar_prefetch=0,
            grid=(grid_steps,),
            in_specs=[
                pl.BlockSpec((tm, _LANE), lambda i: (i, 0)),
                pl.BlockSpec((tm, _LANE), lambda i: (i, 0)),
            ],
            out_specs=pl.BlockSpec((1, _LANE), lambda i: (0, 0)),
        ),
        compiler_params=pltpu.CompilerParams(
            dimension_semantics=("arbitrary",),
        ),
    )(x2, y2)

    # TODO(synk): on v7x, shard the row range across the 2 TensorCores with a
    # leading "parallel" grid axis and per-core partial rows for ~2x bandwidth.
    total = jnp.sum(partial)
    if lane_pad:
        total = total - jnp.float32(lane_pad * _LN2)
    return total / jnp.float32(n)


def _reference(y_pred, y_true):
    x = y_pred.astype(jnp.float32)
    y = y_true.astype(jnp.float32)
    loss = jnp.maximum(x, 0.0) - x * y + jnp.log1p(jnp.exp(-jnp.abs(x)))
    return jnp.mean(loss)


if __name__ == "__main__":
    key = jax.random.PRNGKey(0)
    k1, k2 = jax.random.split(key)

    # Discriminator-style logits and {0,1} targets, NCHW-like shape.
    y_pred = jax.random.normal(k1, (2, 4, 16, 16), dtype=jnp.float32) * 2.0
    y_true = (jax.random.uniform(k2, (2, 4, 16, 16)) > 0.5).astype(jnp.float32)

    out = adversarial_loss(y_pred, y_true)
    out = jax.block_until_ready(out)

    ref = _reference(y_pred, y_true)
    assert jnp.allclose(out, ref, rtol=1e-5, atol=1e-5), (out, ref)

    print("KERNEL_OK")
</pallas_src>

<mosaic_0001>
module attributes {stable_mosaic.version = 11 : i64} {
  func.func @kernel(%arg0: i32, %arg1: memref<16x128xf32, #tpu.memory_space<vmem>>, %arg2: memref<16x128xf32, #tpu.memory_space<vmem>>, %arg3: memref<1x128xf32, #tpu.memory_space<vmem>>) attributes {dimension_semantics = [#tpu.dimension_semantics<arbitrary>], iteration_bounds = array<i64: 1>, scalar_prefetch = 0 : i64, scratch_operands = 0 : i64, tpu.core_type = #tpu.core_type<tc>, window_params = [{transform_indices = @transform_0, window_bounds = array<i64: 16, 128>}, {transform_indices = @transform_1, window_bounds = array<i64: 16, 128>}, {pipeline_mode = #tpu.pipeline_mode<synchronous>, transform_indices = @transform_2, window_bounds = array<i64: 1, 128>}]} {
    %c0_i32 = arith.constant 0 : i32
    %0 = arith.cmpi eq, %arg0, %c0_i32 : i32
    %1 = arith.extui %0 : i1 to i32
    %c0_i32_0 = arith.constant 0 : i32
    %2 = arith.cmpi ne, %1, %c0_i32_0 : i32
    scf.if %2 {
      %cst_10 = arith.constant 0.000000e+00 : f32
      %20 = vector.broadcast %cst_10 : f32 to vector<1x128xf32>
      %c0_11 = arith.constant 0 : index
      %c0_12 = arith.constant 0 : index
      %21 = vector.load %arg3[%c0_11, %c0_12] : memref<1x128xf32, #tpu.memory_space<vmem>>, vector<1x128xf32>
      tpu.vector_store %arg3[%c0_11, %c0_12], %20 {strides = array<i32>} : memref<1x128xf32, #tpu.memory_space<vmem>>, vector<1x128xf32>,
    } else {
    }
    %c0 = arith.constant 0 : index
    %c0_1 = arith.constant 0 : index
    %3 = vector.load %arg1[%c0, %c0_1] : memref<16x128xf32, #tpu.memory_space<vmem>>, vector<16x128xf32>
    %c0_2 = arith.constant 0 : index
    %c0_3 = arith.constant 0 : index
    %4 = vector.load %arg2[%c0_2, %c0_3] : memref<16x128xf32, #tpu.memory_space<vmem>>, vector<16x128xf32>
    %cst = arith.constant 0.000000e+00 : f32
    %5 = vector.broadcast %cst : f32 to vector<16x128xf32>
    %6 = arith.maximumf %3, %5 : vector<16x128xf32>
    %7 = arith.mulf %3, %4 : vector<16x128xf32>
    %8 = arith.subf %6, %7 : vector<16x128xf32>
    %9 = math.absf %3 : vector<16x128xf32>
    %cst_4 = arith.constant 0.000000e+00 : f32
    %10 = vector.broadcast %cst_4 : f32 to vector<16x128xf32>
    %11 = arith.subf %10, %9 : vector<16x128xf32>
    %12 = math.exp %11 : vector<16x128xf32>
    %13 = math.log1p %12 : vector<16x128xf32>
    %14 = arith.addf %8, %13 : vector<16x128xf32>
    %c0_5 = arith.constant 0 : index
    %c0_6 = arith.constant 0 : index
    %15 = vector.load %arg3[%c0_5, %c0_6] : memref<1x128xf32, #tpu.memory_space<vmem>>, vector<1x128xf32>
    %cst_7 = arith.constant dense<0.000000e+00> : vector<128xf32>
    %16 = vector.multi_reduction <add>, %14, %cst_7 [0] : vector<16x128xf32> to vector<128xf32>
    %17 = vector.shape_cast %16 : vector<128xf32> to vector<1x128xf32>
    %18 = arith.addf %15, %17 : vector<1x128xf32>
    %c0_8 = arith.constant 0 : index
    %c0_9 = arith.constant 0 : index
    %19 = vector.load %arg3[%c0_8, %c0_9] : memref<1x128xf32, #tpu.memory_space<vmem>>, vector<1x128xf32>
    tpu.vector_store %arg3[%c0_8, %c0_9], %18 {strides = array<i32>} : memref<1x128xf32, #tpu.memory_space<vmem>>, vector<1x128xf32>,
    return
  }
  func.func @transform_0(%arg0: i32) -> (i32, i32) {
    %c0_i32 = arith.constant 0 : i32
    %c0_i32_0 = arith.constant 0 : i32
    return %arg0, %c0_i32 : i32, i32
  }
  func.func @transform_1(%arg0: i32) -> (i32, i32) {
    %c0_i32 = arith.constant 0 : i32
    %c0_i32_0 = arith.constant 0 : i32
    return %arg0, %c0_i32 : i32, i32
  }
  func.func @transform_2(%arg0: i32) -> (i32, i32) {
    %c0_i32 = arith.constant 0 : i32
    %c0_i32_0 = arith.constant 0 : i32
    %c0_i32_1 = arith.constant 0 : i32
    return %c0_i32, %c0_i32_0 : i32, i32
  }
}

</mosaic_0001>

<bundles_post_ra>
// kernel: tpu_custom_call.1
= control target key start
LH: loop header
LB: loop body
LE: loop exit
PB: predicated region body
PF: predicated region fallthrough
CT: control target
= control target key end

     0   :  { %7 = vsyncpa [#allocation3], 0  ;;  %s252_s0 = inlined_call_operand.hbm [shape: f32[16,128], index: 0, kind: input, shape index: {}]   ;;  %s253_s1 = inlined_call_operand.hbm [shape: f32[16,128], index: 1, kind: input, shape index: {}]   ;;  %s254_s2 = inlined_call_operand.hbm [shape: f32[1,128], index: 2, kind: output, shape index: {}]  }
   0x1   :  { %8 = vsyncpa [#allocation6], 0 }
   0x2   :  { %9 = vsyncpa [#allocation4], 0  ;;  %s195_s9 = smov [#allocation2]   ;;  %s123_s13 = scalar_lea.hbm %s252_s0, 256 }
   0x3   :  { %s15_s10 = sshll.u32 %s195_s9, 4  ;;  %p124_p0 = scmp.ne.s32.totalorder %s252_s0, %s123_s13  ;;  %s16_s10 = int_to_ptr.vmem [resolvable:$true] %s15_s10 }
   0x4   :  { %p127_p1 = scmp.lt.u32.totalorder %s123_s13, %s252_s0 }
   0x6   :  { %p129_p2 = pnand %p127_p1, %p124_p0 }
   0x8   :  { %132 = shalt.err (!%p129_p2)
}
   0x9   :  { %s133_s18 = scalar_lea.vmem %s16_s10, 256  ;;  %p138_p4 = scmp.lt.s32.totalorder %s16_s10, %s16_s10 }
   0xa   :  { %p134_p3 = scmp.ne.s32.totalorder %s16_s10, %s133_s18  ;;  %p139_p5 = scmp.lt.s32.totalorder %s133_s18, %s133_s18 }
   0xc   :  { %p140_p6 = por %p139_p5, %p138_p4 }
   0xe   :  { %p141_p7 = pnand %p140_p6, %p134_p3 }
  0x10   :  { %144 = shalt.err (!%p141_p7)
}
  0x11   :  { %s196_s19 = smov 128   ;;  %s197_s20 = smov 8  }
  0x12   :  { %21 = dma.hbm_to_vmem [thread:$0]  %s252_s0, 256, %s16_s10, [#allocation3], %s196_s19, %s196_s19, %s197_s20  }
  0x13   :  { %s198_s23 = smov [#allocation5]   ;;  %s145_s27 = scalar_lea.hbm %s253_s1, 256 }
  0x14   :  { %s27_s24 = sshll.u32 %s198_s23, 4  ;;  %p146_p8 = scmp.ne.s32.totalorder %s253_s1, %s145_s27  ;;  %s28_s24 = int_to_ptr.vmem [resolvable:$true] %s27_s24 }
  0x15   :  { %p149_p9 = scmp.lt.u32.totalorder %s145_s27, %s253_s1 }
  0x17   :  { %p151_p10 = pnand %p149_p9, %p146_p8 }
  0x19   :  { %154 = shalt.err (!%p151_p10)
}
  0x1a   :  { %s155_s4 = scalar_lea.vmem %s28_s24, 256  ;;  %p160_p12 = scmp.lt.s32.totalorder %s28_s24, %s28_s24 }
  0x1b   :  { %p156_p11 = scmp.ne.s32.totalorder %s28_s24, %s155_s4  ;;  %p161_p13 = scmp.lt.s32.totalorder %s155_s4, %s155_s4 }
  0x1d   :  { %p162_p0 = por %p161_p13, %p160_p12 }
  0x1f   :  { %p163_p1 = pnand %p162_p0, %p156_p11 }
  0x21   :  { %166 = shalt.err (!%p163_p1)
}
  0x22   :  { %33 = dma.hbm_to_vmem [thread:$0]  %s253_s1, 256, %s28_s24, [#allocation6], %s196_s19, %s196_s19, %s197_s20  }
  0x23   :  { %189 = dma.done.wait [#allocation3], 256  }
  0x24   :  { %190 = vsyncadd [#allocation3], 4294967040 }
  0x25   :  { %191 = dma.done.wait [#allocation6], 256  }
  0x26   :  { %192 = vsyncadd [#allocation6], 4294967040  ;;  %v199_v0 = vmov 0.0   ;;  %v45_v1 = vld [vmem:[#allocation2] sm:$0xff]  ;;  %v46_v2 = vld [vmem:[#allocation2 + $0x8] sm:$0xff]  ;;  %s200_s1 = smov [#allocation7]  }
  0x27   :  { %44 = vst [vmem:[#allocation7] sm:$0x1] %v199_v0  ;;  %v55_v3 = vand.u32 2147483647, %v45_v1  ;;  %v56_v4 = vand.u32 2147483647, %v46_v2 }
  0x28   :  { %v47_v15 = vld [vmem:[#allocation5] sm:$0xff]  ;;  %v48_v16 = vld [vmem:[#allocation5 + $0x8] sm:$0xff]  ;;  %v49_v18 = vmax.f32 %v45_v1, 0.0  ;;  %v50_v22 = vmax.f32 %v46_v2, 0.0  ;;  %s99_s6 = sshll.u32 %s200_s1, 4  ;;  %s100_s6 = int_to_ptr.vmem [resolvable:$true] %s99_s6 }
  0x29   :  { %v57_v5 = vsub.f32 0.0, %v55_v3  ;;  %v58_v6 = vsub.f32 0.0, %v56_v4  ;;  %v51_v19 = vmul.f32 %v47_v15, %v45_v1  ;;  %v52_v23 = vmul.f32 %v48_v16, %v46_v2  ;;  %s167_s7 = scalar_lea.vmem %s100_s6, 16  ;;  %s171_s8 = scalar_lea.vmem %s100_s6, 32 }
  0x2a   :  { %p168_p2 = scmp.ne.s32.totalorder %s100_s6, %s167_s7  ;;  %p172_p3 = scmp.lt.s32.totalorder %s100_s6, %s100_s6 }
  0x2b   :  { %v59_v7 = vmul.f32 1.442695, %v57_v5  ;;  %v61_v8 = vmul.f32 1.442695, %v58_v6  ;;  %v53_v27 = vsub.f32 %v49_v18, %v51_v19  ;;  %v54_v30 = vsub.f32 %v50_v22, %v52_v23  ;;  %p173_p4 = scmp.lt.s32.totalorder %s171_s8, %s167_s7 }
  0x2d   :  { %115 = vpow2.f32 %v59_v7  ;;  %p174_p5 = por %p173_p4, %p172_p3 }
  0x2e   :  { %117 = vpow2.f32 %v61_v8  ;;  %v83_v43 = vld [vmem:[#allocation7] sm:$0x1] }
  0x2f   :  { %p175_p6 = pnand %p174_p5, %p168_p2 }
  0x37   :  { %v116_v9 = vpop.eup %115 }
  0x38   :  { %v118_v10 = vpop.eup %117  ;;  %v63_v11 = vadd.f32 1.0, %v116_v9  ;;  %v66_v13 = vmul.f32 -0.5, %v116_v9  ;;  %v69_v20 = vand.u32 2147483647, %v116_v9 }
  0x39   :  { %v72_v12 = vadd.f32 1.0, %v118_v10  ;;  %v75_v14 = vmul.f32 -0.5, %v118_v10  ;;  %v78_v24 = vand.u32 2147483647, %v118_v10 }
  0x3a   :  { %119 = vlog2.f32 %v63_v11  ;;  %v67_v17 = vadd.f32 1.0, %v66_v13  ;;  %vm70_vm0 = vcmp.lt.f32.partialorder %v69_v20, 0.0004427343 }
  0x3b   :  { %121 = vlog2.f32 %v72_v12  ;;  %v76_v21 = vadd.f32 1.0, %v75_v14  ;;  %vm79_vm1 = vcmp.lt.f32.partialorder %v78_v24, 0.0004427343 }
  0x3c   :  { %v68_v25 = vmul.f32 %v116_v9, %v67_v17 }
  0x3d   :  { %v77_v28 = vmul.f32 %v118_v10, %v76_v21 }
  0x44   :  { %v120_v26 = vpop.eup %119 }
  0x45   :  { %v122_v29 = vpop.eup %121  ;;  %v65_v31 = vmul.f32 0.6931472, %v120_v26 }
  0x46   :  { %v74_v32 = vmul.f32 0.6931472, %v122_v29 }
  0x47   :  { %v71_v33 = vsel %vm70_vm0, %v68_v25, %v65_v31 }
  0x48   :  { %v80_v34 = vsel %vm79_vm1, %v77_v28, %v74_v32  ;;  %v81_v35 = vadd.f32 %v71_v33, %v53_v27 }
  0x49   :  { %v82_v36 = vadd.f32 %v80_v34, %v54_v30 }
  0x4b   :  { %v84_v37 = vadd.f32 %v82_v36, %v81_v35 }
  0x4d   :  { %v85_v38 = vrot.slane %v84_v37, 4 }
  0x4f   :  { %v86_v39 = vadd.f32 %v85_v38, %v84_v37 }
  0x51   :  { %v87_v40 = vrot.slane %v86_v39, 2 }
  0x53   :  { %v88_v41 = vadd.f32 %v87_v40, %v86_v39 }
  0x55   :  { %v89_v42 = vrot.slane %v88_v41, 1 }
  0x57   :  { %v90_v44 = vadd.f32 %v89_v42, %v88_v41 }
  0x59   :  { %v91_v45 = vadd.f32 %v90_v44, %v83_v43 }
  0x5b   :  { %92 = vst [vmem:[#allocation7] sm:$0x1] %v91_v45 }
  0x5c   :  { %178 = shalt.err (!%p175_p6)
}
  0x5d   :  { %s179_s11 = scalar_lea.hbm %s254_s2, 16 }
  0x5e   :  { %p180_p7 = scmp.ne.s32.totalorder %s254_s2, %s179_s11  ;;  %p183_p8 = scmp.lt.u32.totalorder %s179_s11, %s254_s2 }
  0x60   :  { %p185_p9 = pnand %p183_p8, %p180_p7 }
  0x62   :  { %188 = shalt.err (!%p185_p9)
}
  0x63   :  { %102 = dma.vmem_to_hbm [thread:$0]  %s100_s6, 16, %s254_s2, [#allocation4]  }
  0x64   :  { %193 = dma.done.wait [#allocation4], 16  }
  0x65   :  { %194 = vsyncadd [#allocation4], 4294967280 }
  0x66   :  { %106 = vsyncpa [#allocation3], 1 }
  0x67   :  { %107 = vsyncpa [#allocation6], 1 }
  0x68   :  { %108 = vsyncpa [#allocation4], 1 }

</bundles_post_ra>
